<compile_context>
chip_gen: v7x
topology: tpu7x:2x2x1
jax: 0.10.0
libtpu: 0.0.40
codegen_flags: <defaults>
</compile_context>

<pallas_src>
import jax
import jax.numpy as jnp
from jax.experimental import pallas as pl
from jax.experimental.pallas import tpu as pltpu

LANE = 128  # vreg lane width / MXU-friendly padding target for the hidden dim


def _round_up(x, m):
    return ((x + m - 1) // m) * m


def value_network_kernel(s_ref, w1_ref, w2_ref, bw_ref, o_ref):
    """Fused 3-layer value MLP on one batch tile.

    relu(x@W1+b1) -> relu(.@W2+b2) -> sum(. * w3_row) + b3
    bw_ref packs: row0=b1, row1=b2, row2[col0]=b3, row3=linear3 weight column.
    """
    x = s_ref[...]                                   # (tb, sd)
    b1 = bw_ref[0:1, :]                              # (1, hp)
    b2 = bw_ref[1:2, :]                              # (1, hp)
    b3 = bw_ref[2:3, 0:1]                            # (1, 1)
    w3_row = bw_ref[3:4, :]                          # (1, hp)

    h1 = jnp.dot(x, w1_ref[...], preferred_element_type=jnp.float32) + b1
    h1 = jnp.maximum(h1, 0.0)
    h2 = jnp.dot(h1, w2_ref[...], preferred_element_type=jnp.float32) + b2
    h2 = jnp.maximum(h2, 0.0)
    # Layer 3 (out_features=1): VPU multiply + lane reduce instead of a third
    # full-width MXU matmul whose RHS is 127/128 zeros.
    val = jnp.sum(h2 * w3_row, axis=-1, keepdims=True) + b3     # (tb, 1)
    o_ref[...] = val.astype(o_ref.dtype)


def value_network_forward(state, w1p, w2p, bias_w3, *, block_batch=8192):
    """state: (batch, state_dim) f32.  Params from init_value_network_params.
    Returns (batch, 1) values."""
    batch, sd = state.shape
    hp = w1p.shape[1]                       # lane-padded hidden width (>=128)
    assert w1p.shape == (sd, hp)
    assert w2p.shape == (hp, hp)
    assert bias_w3.shape == (8, hp)

    # Batch tile: multiple of 8 sublanes.  For non-trivial batches make sure
    # the grid has at least 2 steps so v7x's two TensorCores both get work.
    tb = min(block_batch, _round_up(batch, 8))
    if batch >= 256:
        tb = min(tb, _round_up((batch + 1) // 2, 128))
    pb = _round_up(batch, tb)
    if pb != batch:
        state = jnp.pad(state, ((0, pb - batch), (0, 0)))
    grid = (pb // tb,)

    flops = 2 * pb * (sd * hp + hp * hp + hp)
    bytes_accessed = 4 * (pb * sd + sd * hp + hp * hp + 8 * hp + pb * 1)

    out = pl.pallas_call(
        value_network_kernel,
        out_shape=jax.ShapeDtypeStruct((pb, 1), jnp.float32),
        grid=grid,
        in_specs=[
            pl.BlockSpec((tb, sd), lambda i: (i, 0)),   # state tile, pipelined
            pl.BlockSpec((sd, hp), lambda i: (0, 0)),   # W1 resident
            pl.BlockSpec((hp, hp), lambda i: (0, 0)),   # W2 resident
            pl.BlockSpec((8, hp), lambda i: (0, 0)),    # biases + w3 row, resident
        ],
        out_specs=pl.BlockSpec((tb, 1), lambda i: (i, 0)),   # one value per row
        compiler_params=pltpu.CompilerParams(
            dimension_semantics=("parallel",),           # megacore split on v7x
            vmem_limit_bytes=32 * 1024 * 1024),          # headroom on v5e (16 MiB default)
        cost_estimate=pl.CostEstimate(
            flops=flops, transcendentals=0, bytes_accessed=bytes_accessed),
    )(state, w1p, w2p, bias_w3)

    return out[:batch]


def init_value_network_params(key, state_dim, hidden_dim, init_w=0.003):
    """PyTorch-default-style init, pre-padded to the 128-lane width.

    linear1/linear2: U(-1/sqrt(fan_in), 1/sqrt(fan_in)); linear3: U(-init_w, init_w).
    Returns (w1p, w2p, bias_w3) with
      w1p:     (state_dim, HP)  real data in cols [:hidden_dim]
      w2p:     (HP, HP)         real data in block [:hidden_dim, :hidden_dim]
      bias_w3: (8, HP)          row0=b1, row1=b2, row2[col0]=b3,
                                row3[:hidden_dim]=linear3 weight column, rest zero.
    """
    hp = _round_up(max(hidden_dim, LANE), LANE)
    k1, k2, k3, k4, k5, k6 = jax.random.split(key, 6)
    bound1 = 1.0 / jnp.sqrt(jnp.float32(state_dim))
    bound2 = 1.0 / jnp.sqrt(jnp.float32(hidden_dim))

    w1 = jax.random.uniform(k1, (state_dim, hidden_dim), jnp.float32, -bound1, bound1)
    b1 = jax.random.uniform(k2, (hidden_dim,), jnp.float32, -bound1, bound1)
    w2 = jax.random.uniform(k3, (hidden_dim, hidden_dim), jnp.float32, -bound2, bound2)
    b2 = jax.random.uniform(k4, (hidden_dim,), jnp.float32, -bound2, bound2)
    w3 = jax.random.uniform(k5, (hidden_dim, 1), jnp.float32, -init_w, init_w)
    b3 = jax.random.uniform(k6, (1,), jnp.float32, -init_w, init_w)

    w1p = jnp.zeros((state_dim, hp), jnp.float32).at[:, :hidden_dim].set(w1)
    w2p = jnp.zeros((hp, hp), jnp.float32).at[:hidden_dim, :hidden_dim].set(w2)
    bias_w3 = (jnp.zeros((8, hp), jnp.float32)
               .at[0, :hidden_dim].set(b1)
               .at[1, :hidden_dim].set(b2)
               .at[2, :1].set(b3)
               .at[3, :hidden_dim].set(w3[:, 0]))
    return w1p, w2p, bias_w3


if __name__ == "__main__":
    key = jax.random.PRNGKey(0)
    batch, state_dim, hidden_dim = 8, 16, 32

    pkey, skey = jax.random.split(key)
    w1p, w2p, bias_w3 = init_value_network_params(pkey, state_dim, hidden_dim)
    state = jax.random.normal(skey, (batch, state_dim), dtype=jnp.float32)

    out = value_network_forward(state, w1p, w2p, bias_w3)
    out = jax.block_until_ready(out)

    # Pure-JAX reference on the unpadded parameter views.
    h = hidden_dim
    w1, b1 = w1p[:, :h], bias_w3[0, :h]
    w2, b2 = w2p[:h, :h], bias_w3[1, :h]
    w3, b3 = bias_w3[3, :h], bias_w3[2, 0]
    ref = jnp.maximum(state @ w1 + b1, 0.0)
    ref = jnp.maximum(ref @ w2 + b2, 0.0)
    ref = ref @ w3[:, None] + b3

    assert out.shape == (batch, 1)
    assert jnp.allclose(out, ref, atol=1e-5, rtol=1e-5)

    print("KERNEL_OK")
</pallas_src>

<mosaic_0001>
module attributes {stable_mosaic.version = 11 : i64} {
  func.func @value_network_kernel(%arg0: i32, %arg1: memref<8x16xf32, #tpu.memory_space<vmem>>, %arg2: memref<16x128xf32, #tpu.memory_space<vmem>>, %arg3: memref<128x128xf32, #tpu.memory_space<vmem>>, %arg4: memref<8x128xf32, #tpu.memory_space<vmem>>, %arg5: memref<8x1xf32, #tpu.memory_space<vmem>>) attributes {dimension_semantics = [#tpu.dimension_semantics<parallel>], iteration_bounds = array<i64: 1>, scalar_prefetch = 0 : i64, scratch_operands = 0 : i64, tpu.core_type = #tpu.core_type<tc>, window_params = [{transform_indices = @transform_0, window_bounds = array<i64: 8, 16>}, {pipeline_mode = #tpu.pipeline_mode<synchronous>, transform_indices = @transform_1, window_bounds = array<i64: 16, 128>}, {pipeline_mode = #tpu.pipeline_mode<synchronous>, transform_indices = @transform_2, window_bounds = array<i64: 128, 128>}, {pipeline_mode = #tpu.pipeline_mode<synchronous>, transform_indices = @transform_3, window_bounds = array<i64: 8, 128>}, {transform_indices = @transform_4, window_bounds = array<i64: 8, 1>}]} {
    %c0 = arith.constant 0 : index
    %c0_0 = arith.constant 0 : index
    %0 = vector.load %arg1[%c0, %c0_0] : memref<8x16xf32, #tpu.memory_space<vmem>>, vector<8x16xf32>
    %c0_1 = arith.constant 0 : index
    %c0_2 = arith.constant 0 : index
    %1 = vector.load %arg4[%c0_1, %c0_2] : memref<8x128xf32, #tpu.memory_space<vmem>>, vector<1x128xf32>
    %c1 = arith.constant 1 : index
    %c0_3 = arith.constant 0 : index
    %2 = vector.load %arg4[%c1, %c0_3] : memref<8x128xf32, #tpu.memory_space<vmem>>, vector<1x128xf32>
    %c2 = arith.constant 2 : index
    %c0_4 = arith.constant 0 : index
    %3 = vector.load %arg4[%c2, %c0_4] : memref<8x128xf32, #tpu.memory_space<vmem>>, vector<1x1xf32>
    %c3 = arith.constant 3 : index
    %c0_5 = arith.constant 0 : index
    %4 = vector.load %arg4[%c3, %c0_5] : memref<8x128xf32, #tpu.memory_space<vmem>>, vector<1x128xf32>
    %c0_6 = arith.constant 0 : index
    %c0_7 = arith.constant 0 : index
    %5 = vector.load %arg2[%c0_6, %c0_7] : memref<16x128xf32, #tpu.memory_space<vmem>>, vector<16x128xf32>
    %cst = arith.constant dense<0.000000e+00> : vector<8x128xf32>
    %6 = tpu.matmul %0, %5, %cst {dimension_numbers = #tpu.dot_dimension_numbers<[1], [0], [0], [1], [0, 0, 1, 1], [], []>} : vector<8x16xf32>, vector<16x128xf32>, vector<8x128xf32> -> vector<8x128xf32>
    %7 = vector.broadcast %1 : vector<1x128xf32> to vector<8x128xf32>
    %8 = arith.addf %6, %7 : vector<8x128xf32>
    %cst_8 = arith.constant 0.000000e+00 : f32
    %9 = vector.broadcast %cst_8 : f32 to vector<8x128xf32>
    %10 = arith.maximumf %8, %9 : vector<8x128xf32>
    %c0_9 = arith.constant 0 : index
    %c0_10 = arith.constant 0 : index
    %11 = vector.load %arg3[%c0_9, %c0_10] : memref<128x128xf32, #tpu.memory_space<vmem>>, vector<128x128xf32>
    %cst_11 = arith.constant dense<0.000000e+00> : vector<8x128xf32>
    %12 = tpu.matmul %10, %11, %cst_11 {dimension_numbers = #tpu.dot_dimension_numbers<[1], [0], [0], [1], [0, 0, 1, 1], [], []>} : vector<8x128xf32>, vector<128x128xf32>, vector<8x128xf32> -> vector<8x128xf32>
    %13 = vector.broadcast %2 : vector<1x128xf32> to vector<8x128xf32>
    %14 = arith.addf %12, %13 : vector<8x128xf32>
    %cst_12 = arith.constant 0.000000e+00 : f32
    %15 = vector.broadcast %cst_12 : f32 to vector<8x128xf32>
    %16 = arith.maximumf %14, %15 : vector<8x128xf32>
    %17 = vector.broadcast %4 : vector<1x128xf32> to vector<8x128xf32>
    %18 = arith.mulf %16, %17 : vector<8x128xf32>
    %cst_13 = arith.constant dense<0.000000e+00> : vector<8xf32>
    %19 = vector.multi_reduction <add>, %18, %cst_13 [1] : vector<8x128xf32> to vector<8xf32>
    %20 = vector.shape_cast %19 : vector<8xf32> to vector<8x1xf32>
    %21 = vector.broadcast %3 : vector<1x1xf32> to vector<8x1xf32>
    %22 = arith.addf %20, %21 : vector<8x1xf32>
    %c0_14 = arith.constant 0 : index
    %c0_15 = arith.constant 0 : index
    %23 = vector.load %arg5[%c0_14, %c0_15] : memref<8x1xf32, #tpu.memory_space<vmem>>, vector<8x1xf32>
    tpu.vector_store %arg5[%c0_14, %c0_15], %22 {strides = array<i32>} : memref<8x1xf32, #tpu.memory_space<vmem>>, vector<8x1xf32>,
    return
  }
  func.func @transform_0(%arg0: i32) -> (i32, i32) {
    %c0_i32 = arith.constant 0 : i32
    %c0_i32_0 = arith.constant 0 : i32
    return %arg0, %c0_i32 : i32, i32
  }
  func.func @transform_1(%arg0: i32) -> (i32, i32) {
    %c0_i32 = arith.constant 0 : i32
    %c0_i32_0 = arith.constant 0 : i32
    %c0_i32_1 = arith.constant 0 : i32
    return %c0_i32, %c0_i32_0 : i32, i32
  }
  func.func @transform_2(%arg0: i32) -> (i32, i32) {
    %c0_i32 = arith.constant 0 : i32
    %c0_i32_0 = arith.constant 0 : i32
    %c0_i32_1 = arith.constant 0 : i32
    return %c0_i32, %c0_i32_0 : i32, i32
  }
  func.func @transform_3(%arg0: i32) -> (i32, i32) {
    %c0_i32 = arith.constant 0 : i32
    %c0_i32_0 = arith.constant 0 : i32
    %c0_i32_1 = arith.constant 0 : i32
    return %c0_i32, %c0_i32_0 : i32, i32
  }
  func.func @transform_4(%arg0: i32) -> (i32, i32) {
    %c0_i32 = arith.constant 0 : i32
    %c0_i32_0 = arith.constant 0 : i32
    return %arg0, %c0_i32 : i32, i32
  }
}

</mosaic_0001>

<bundles_post_ra>
// kernel: tpu_custom_call.1
= control target key start
LH: loop header
LB: loop body
LE: loop exit
PB: predicated region body
PF: predicated region fallthrough
CT: control target
= control target key end

     0   :  { %9 = vsyncpa [#allocation3], 0  ;;  %s515_s0 = inlined_call_operand.hbm [shape: f32[8,16], index: 0, kind: input, shape index: {}]   ;;  %s516_s1 = inlined_call_operand.hbm [shape: f32[16,128], index: 1, kind: input, shape index: {}]   ;;  %s517_s2 = inlined_call_operand.hbm [shape: f32[128,128], index: 2, kind: input, shape index: {}]   ;;  %s518_s3 = inlined_call_operand.vmem [shape: f32[8,128], index: 3, kind: input, shape index: {}]   ;;  %s519_s4 = inlined_call_operand.vmem [shape: f32[8,1], index: 4, kind: output, shape index: {}]  }
   0x1   :  { %10 = vsyncpa [#allocation5], 0  ;;  %s425_s15 = smov [#allocation4]   ;;  %s355_s19 = scalar_lea.hbm %s516_s1, 256 }
   0x2   :  { %s26_s16 = sshll.u32 %s425_s15, 4  ;;  %p356_p0 = scmp.ne.s32.totalorder %s516_s1, %s355_s19  ;;  %s27_s16 = int_to_ptr.vmem [resolvable:$true] %s26_s16 }
   0x3   :  { %p359_p1 = scmp.lt.u32.totalorder %s355_s19, %s516_s1 }
   0x5   :  { %p361_p2 = pnand %p359_p1, %p356_p0 }
   0x7   :  { %364 = shalt.err (!%p361_p2)
}
   0x8   :  { %s365_s24 = scalar_lea.vmem %s27_s16, 256  ;;  %p370_p4 = scmp.lt.s32.totalorder %s27_s16, %s27_s16 }
   0x9   :  { %p366_p3 = scmp.ne.s32.totalorder %s27_s16, %s365_s24  ;;  %p371_p5 = scmp.lt.s32.totalorder %s365_s24, %s365_s24 }
   0xb   :  { %p372_p6 = por %p371_p5, %p370_p4 }
   0xd   :  { %p373_p7 = pnand %p372_p6, %p366_p3 }
   0xf   :  { %376 = shalt.err (!%p373_p7)
}
  0x10   :  { %s426_s25 = smov 128   ;;  %s427_s26 = smov 8  }
  0x11   :  { %32 = dma.hbm_to_vmem [thread:$0]  %s516_s1, 256, %s27_s16, [#allocation5], %s426_s25, %s426_s25, %s427_s26  }
  0x12   :  { %s428_s29 = smov [#allocation2]   ;;  %s429_s5 = smov [#allocation6]  }
  0x13   :  { %s17_s30 = sshll.u32 %s428_s29, 4  ;;  %s38_s6 = sshll.u32 %s429_s5, 4  ;;  %s18_s30 = int_to_ptr.vmem [resolvable:$true] %s17_s30  ;;  %s39_s6 = int_to_ptr.vmem [resolvable:$true] %s38_s6 }
  0x14   :  { %s377_s9 = scalar_lea.hbm %s515_s0, 128 }
  0x15   :  { %p378_p8 = scmp.ne.s32.totalorder %s515_s0, %s377_s9  ;;  %p381_p9 = scmp.lt.u32.totalorder %s377_s9, %s515_s0 }
  0x17   :  { %p383_p10 = pnand %p381_p9, %p378_p8 }
  0x19   :  { %386 = shalt.err (!%p383_p10)
}
  0x1a   :  { %s387_s1 = scalar_lea.vmem %s18_s30, 128  ;;  %p392_p12 = scmp.lt.s32.totalorder %s18_s30, %s18_s30 }
  0x1b   :  { %p388_p11 = scmp.ne.s32.totalorder %s18_s30, %s387_s1  ;;  %p393_p13 = scmp.lt.s32.totalorder %s387_s1, %s387_s1 }
  0x1d   :  { %p394_p0 = por %p393_p13, %p392_p12 }
  0x1f   :  { %p395_p1 = pnand %p394_p0, %p388_p11 }
  0x21   :  { %398 = shalt.err (!%p395_p1)
}
  0x22   :  { %20 = dma.hbm_to_vmem [thread:$0]  %s515_s0, 128, %s18_s30, [#allocation3]  }
  0x23   :  { %s399_s18 = scalar_lea.hbm %s517_s2, 2048 }
  0x24   :  { %p400_p2 = scmp.ne.s32.totalorder %s517_s2, %s399_s18  ;;  %p403_p3 = scmp.lt.u32.totalorder %s399_s18, %s517_s2 }
  0x26   :  { %p405_p4 = pnand %p403_p3, %p400_p2 }
  0x28   :  { %408 = shalt.err (!%p405_p4)
}
  0x29   :  { %s409_s23 = scalar_lea.vmem %s39_s6, 2048  ;;  %p414_p6 = scmp.lt.s32.totalorder %s39_s6, %s39_s6 }
  0x2a   :  { %p410_p5 = scmp.ne.s32.totalorder %s39_s6, %s409_s23  ;;  %p415_p7 = scmp.lt.s32.totalorder %s409_s23, %s409_s23 }
  0x2c   :  { %p416_p8 = por %p415_p7, %p414_p6 }
  0x2e   :  { %p417_p9 = pnand %p416_p8, %p410_p5 }
  0x30   :  { %420 = shalt.err (!%p417_p9)
}
  0x31   :  { %44 = dma.hbm_to_vmem [thread:$0]  %s517_s2, 2048, %s39_s6, [#allocation5], %s426_s25, %s426_s25, %s427_s26  }
  0x32   :  { %421 = dma.done.wait [#allocation3], 128  }
  0x33   :  { %422 = vsyncadd [#allocation3], 4294967168 }
  0x34   :  { %423 = dma.done.wait [#allocation5], 2304  }
  0x35   :  { %424 = vsyncadd [#allocation5], 4294964992  ;;  %v430_v0 = vmov 0.0|0.0   ;;  %vm431_vm0 = vmmov 0   ;;  %v432_v1 = vmov 0.0   ;;  %v61_v2 = vld [vmem:[#allocation4] sm:$0xff] }
  0x36   :  { %320 = vmatprep.subr.bf16.mxu0 %v430_v0  ;;  %282 = vmatprep.mubr.msk.f32.mxu0 %vm431_vm0, %v432_v1  ;;  %v62_v3 = vld [vmem:[#allocation4 + $0x8] sm:$0xff]  ;;  %v142_v5 = vld [vmem:[#allocation6] sm:$0xff]  ;;  %v143_v6 = vld [vmem:[#allocation6 + $0x8] sm:$0xff]  ;;  %vm67_vm1 = vcmask 130048   ;;  %vm245_vm2 = vcmask 7168  }
  0x37   :  { %323 = vmatprep.subr.bf16.mxu1 %v430_v0  ;;  %317 = vmatprep.mubr.msk.f32.mxu1 %vm431_vm0, %v432_v1  ;;  %v321_v4 = vpack.c.bf16 %v62_v3, %v61_v2  ;;  %v144_v7 = vld [vmem:[#allocation6 + $0x10] sm:$0xff]  ;;  %v324_v8 = vpack.c.bf16 %v143_v6, %v142_v5  ;;  %v145_v9 = vld [vmem:[#allocation6 + $0x18] sm:$0xff]  ;;  %v56_v10 = vld [vmem:[#allocation2] sm:$0xff] }
  0x38   :  { %v327_v11 = vpack.c.bf16 %v145_v9, %v144_v7  ;;  %v146_v12 = vld [vmem:[#allocation6 + $0x20] sm:$0xff]  ;;  %v147_v13 = vld [vmem:[#allocation6 + $0x28] sm:$0xff]  ;;  %v148_v15 = vld [vmem:[#allocation6 + $0x30] sm:$0xff] }
  0x39   :  { %322 = vmatpush3.bf16.msra.mxu0 %v321_v4  ;;  %325 = vmatpush3.bf16.msra.mxu1 %v324_v8  ;;  %v330_v14 = vpack.c.bf16 %v147_v13, %v146_v12  ;;  %v149_v16 = vld [vmem:[#allocation6 + $0x38] sm:$0xff]  ;;  %v150_v18 = vld [vmem:[#allocation6 + $0x40] sm:$0xff]  ;;  %v151_v19 = vld [vmem:[#allocation6 + $0x48] sm:$0xff] }
  0x3a   :  { %326 = vmatprep.subr.bf16.mxu1 %v430_v0  ;;  %v333_v17 = vpack.c.bf16 %v149_v16, %v148_v15  ;;  %v336_v20 = vpack.c.bf16 %v151_v19, %v150_v18  ;;  %v152_v21 = vld [vmem:[#allocation6 + $0x50] sm:$0xff]  ;;  %v153_v22 = vld [vmem:[#allocation6 + $0x58] sm:$0xff]  ;;  %v154_v24 = vld [vmem:[#allocation6 + $0x60] sm:$0xff] }
  0x3b   :  { %v339_v23 = vpack.c.bf16 %v153_v22, %v152_v21  ;;  %v155_v25 = vld [vmem:[#allocation6 + $0x68] sm:$0xff]  ;;  %v156_v27 = vld [vmem:[#allocation6 + $0x70] sm:$0xff]  ;;  %v157_v28 = vld [vmem:[#allocation6 + $0x78] sm:$0xff] }
  0x3c   :  { %283 = vmatmul.mubr.msk.f32.vlgmr.msra.gmra.mrb[0].mxu0 %vm67_vm1, %v56_v10  ;;  %v342_v26 = vpack.c.bf16 %v155_v25, %v154_v24  ;;  %v345_v29 = vpack.c.bf16 %v157_v28, %v156_v27  ;;  %v253_v30 = vld [vmem:[%s518_s3] ss:$0 sm:$0xff]  ;;  %v255_v35 = vld [vmem:[%s518_s3 + $0x1] ss:$0 sm:$0xff]  ;;  %v256_v39 = vld [vmem:[%s518_s3 + $0x3] ss:$0 sm:$0xff] }
  0x3d   :  { %328 = vmatpush3.bf16.msra.mxu1 %v327_v11  ;;  %v257_v42 = vld [vmem:[%s518_s3 + $0x2] ss:$0 sm:$0xff] }
  0x3e   :  { %329 = vmatprep.subr.bf16.mxu1 %v430_v0 }
  0x41   :  { %331 = vmatpush3.bf16.msra.mxu1 %v330_v14 }
  0x42   :  { %332 = vmatprep.subr.bf16.mxu1 %v430_v0 }
  0x45   :  { %334 = vmatpush3.bf16.msra.mxu1 %v333_v17 }
  0x46   :  { %335 = vmatprep.subr.bf16.mxu1 %v430_v0 }
  0x49   :  { %337 = vmatpush3.bf16.msra.mxu1 %v336_v20 }
  0x4a   :  { %338 = vmatprep.subr.bf16.mxu1 %v430_v0 }
  0x4d   :  { %340 = vmatpush3.bf16.msra.mxu1 %v339_v23 }
  0x4e   :  { %341 = vmatprep.subr.bf16.mxu1 %v430_v0 }
  0x51   :  { %343 = vmatpush3.bf16.msra.mxu1 %v342_v26 }
  0x52   :  { %344 = vmatprep.subr.bf16.mxu1 %v430_v0 }
  0x55   :  { %346 = vmatpush3.bf16.msra.mxu1 %v345_v29 }
 0x10f   :  { %v137_v31 = vpop.f32.mrb[0].mxu0 }
 0x110   :  { %v138_v32 = vadd.f32 %v253_v30, %v137_v31  ;;  %v284_v33 = vpop.f32.mrb[1].mxu0 }
 0x112   :  { %v141_v34 = vmax.f32 %v138_v32, 0.0 }
 0x114   :  { %318 = vmatmul.mubr.f32.vlgmr.msra.gmra.mrb[0].mxu1 %v141_v34 }
 0x1e7   :  { %v228_v36 = vpop.f32.mrb[0].mxu1 }
 0x1e8   :  { %v229_v37 = vadd.f32 %v255_v35, %v228_v36  ;;  %v319_v38 = vpop.f32.mrb[1].mxu1 }
 0x1ea   :  { %v232_v40 = vmax.f32 %v229_v37, 0.0 }
 0x1ec   :  { %v237_v41 = vmul.f32 %v256_v39, %v232_v40 }
 0x1ee   :  { %238 = vadd.xlane.f32.xlu0 %v237_v41 }
 0x27b   :  { %v239_v43 = vpop.xlane.xlu0 %238 }
 0x27c   :  { %v244_v44 = vadd.f32 %v257_v42, %v239_v43 }
 0x27e   :  { %246 = vst.msk [vmem:[%s519_s4] sm:$0xff] %vm245_vm2, %v244_v44 }
 0x27f   :  { %251 = vsyncpa [#allocation3], 1 }
 0x280   :  { %252 = vsyncpa [#allocation5], 1 }

</bundles_post_ra>
